<compile_context>
chip_gen: v7x
topology: tpu7x:2x2x1
jax: 0.10.0
libtpu: 0.0.40
codegen_flags: <defaults>
</compile_context>

<pallas_src>
import functools

import jax
import jax.numpy as jnp
from jax.experimental import pallas as pl
from jax.experimental.pallas import tpu as pltpu


NEG_MASK = -1e30  # finite "minus infinity": safe in f32 and if bf16 is adopted


def _round_up(x, m):
    return ((x + m - 1) // m) * m


# ----------------------------- parameter handling ------------------------------


def init_raw_params(sizes, key):
    """PyTorch-layout parameters: per hidden layer W(out,in), b, gamma, beta, rm, rv;
    final layer W(out,in), b.  Deterministic from `key`."""
    raw = []
    n_hidden = len(sizes) - 2
    for k in range(n_hidden):
        in_ch, out_ch = sizes[k], sizes[k + 1]
        key, k1, k2, k3, k4, k5, k6 = jax.random.split(key, 7)
        bound = 1.0 / float(in_ch) ** 0.5
        raw.append(dict(
            w=jax.random.uniform(k1, (out_ch, in_ch), jnp.float32, -bound, bound),
            b=jax.random.uniform(k2, (out_ch,), jnp.float32, -bound, bound),
            gamma=jax.random.uniform(k3, (out_ch,), jnp.float32, 0.5, 1.5),
            beta=jax.random.uniform(k4, (out_ch,), jnp.float32, -0.5, 0.5),
            rm=jax.random.uniform(k5, (out_ch,), jnp.float32, -0.5, 0.5),
            rv=jax.random.uniform(k6, (out_ch,), jnp.float32, 0.5, 1.5),
        ))
    in_ch, out_ch = sizes[-2], sizes[-1]
    key, k1, k2 = jax.random.split(key, 3)
    bound = 1.0 / float(in_ch) ** 0.5
    raw.append(dict(
        w=jax.random.uniform(k1, (out_ch, in_ch), jnp.float32, -bound, bound),
        b=jax.random.uniform(k2, (out_ch,), jnp.float32, -bound, bound),
    ))
    return raw


def fold_params(raw, out_features, eps=1e-5, lane=128, dtype=jnp.float32):
    """Fold eval-mode BatchNorm1d into the Linear weights, transpose to (in, out),
    zero-pad every layer's output width to a multiple of 128 lanes (padded hidden
    lanes stay exactly 0 through ReLU; padded final-layer bias = -1e30 so padded
    logits vanish in the log-softmax), and pack all per-layer additive terms into
    one (n_layers, W_max) f32 array.  `dtype` controls the weight/activation
    compute dtype (f32 or bf16)."""
    n_layers = len(raw)
    weights, shift_rows = [], []
    prev_pad = raw[0]["w"].shape[1]            # input feature width (unpadded)
    for k, p in enumerate(raw):
        out_ch, in_ch = p["w"].shape
        w = p["w"].T.astype(jnp.float32)       # (in, out)
        b = p["b"].astype(jnp.float32)
        if k < n_layers - 1:
            scale = p["gamma"] / jnp.sqrt(p["rv"] + eps)
            w = w * scale[None, :]             # fold BN scale into the weights
            b = b * scale + (p["beta"] - p["rm"] * scale)
            out_pad = _round_up(out_ch, lane)
            b_pad_val = 0.0                    # ReLU(0*x + 0) == 0 in padded lanes
        else:
            out_pad = _round_up(out_features, lane)
            b_pad_val = NEG_MASK               # padded logits vanish in log-softmax
        # Pad input rows with zeros up to the previous layer's padded width,
        # and output columns up to this layer's padded width.
        w = jnp.pad(w, ((0, prev_pad - in_ch), (0, out_pad - out_ch)))
        b = jnp.pad(b, (0, out_pad - out_ch), constant_values=b_pad_val)
        weights.append(w.astype(dtype))
        shift_rows.append(b)                   # shifts stay f32 always
        prev_pad = out_pad
    w_max = max(r.shape[0] for r in shift_rows)
    shifts = jnp.stack([jnp.pad(r, (0, w_max - r.shape[0])) for r in shift_rows])
    return weights, shifts


# ----------------------------------- kernel ------------------------------------


def _make_fcnn_kernel(layer_widths, out_store_width):
    """layer_widths: padded (multiple-of-128) output width of every layer."""
    n_layers = len(layer_widths)

    def kernel(*refs):
        x_ref = refs[0]
        w_refs = refs[1:1 + n_layers]
        shifts_ref = refs[1 + n_layers]        # (n_layers, W_max) packed biases
        o_ref = refs[2 + n_layers]

        compute_dtype = w_refs[0].dtype
        h = x_ref[...].astype(compute_dtype)
        for k in range(n_layers - 1):
            width = layer_widths[k]            # multiple of 128 -> lane-aligned slice
            shift = shifts_ref[k:k + 1, :width]
            h = jnp.dot(h, w_refs[k][...], preferred_element_type=jnp.float32) + shift
            h = jnp.maximum(h, 0.0).astype(compute_dtype)

        width = layer_widths[-1]
        shift = shifts_ref[n_layers - 1:n_layers, :width]
        logits = jnp.dot(h, w_refs[-1][...],
                         preferred_element_type=jnp.float32) + shift

        # Padded output lanes carry a baked-in -1e30 bias, so no explicit mask is
        # needed: exp(NEG_MASK - m) underflows to 0 in the log-softmax sum.
        m = jnp.max(logits, axis=1, keepdims=True)
        lse = jnp.log(jnp.sum(jnp.exp(logits - m), axis=1, keepdims=True)) + m
        out = logits - lse
        o_ref[...] = out[:, :out_store_width].astype(o_ref.dtype)

    return kernel


@functools.partial(jax.jit,
                   static_argnames=("out_features", "max_tile_rows",
                                    "pad_output_lanes"))
def fcnn_forward(x, weights, shifts, *, out_features,
                 max_tile_rows=4096, pad_output_lanes=False):
    N, in_features = x.shape
    n_layers = len(weights)
    layer_widths = tuple(w.shape[1] for w in weights)

    # ---- batch tiling: balanced against N; >=2 grid steps for large N so both
    # ---- v7x TensorCores get work (the grid axis is "parallel").
    n_tiles = max(1, pl.cdiv(N, max_tile_rows))
    if N >= 2048:
        n_tiles = max(n_tiles, 2)
    tile_n = _round_up(pl.cdiv(N, n_tiles), 8)
    grid_n = pl.cdiv(N, tile_n)
    n_pad = grid_n * tile_n
    if n_pad != N:
        x = jnp.pad(x, ((0, n_pad - N), (0, 0)))
    if x.dtype != weights[0].dtype:
        x = x.astype(weights[0].dtype)

    out_store_width = layer_widths[-1] if pad_output_lanes else out_features
    kernel = _make_fcnn_kernel(layer_widths, out_store_width)

    in_specs = [pl.BlockSpec((tile_n, in_features), lambda i: (i, 0))]
    # Weights / shifts: constant index_map -> no re-DMA, resident in VMEM across
    # all grid steps.
    # TODO(synk): pipeline_mode=pl.Buffered(1) would drop the unused second
    # pipeline buffer for these resident operands (~tens of KiB); skipped as
    # negligible at these shapes.
    in_specs += [pl.BlockSpec(w.shape, lambda i: (0, 0)) for w in weights]
    in_specs += [pl.BlockSpec(shifts.shape, lambda i: (0, 0))]
    out_spec = pl.BlockSpec((tile_n, out_store_width), lambda i: (i, 0))

    out = pl.pallas_call(
        kernel,
        out_shape=jax.ShapeDtypeStruct((n_pad, out_store_width), jnp.float32),
        grid_spec=pl.GridSpec(
            grid=(grid_n,),
            in_specs=in_specs,
            out_specs=out_spec,
        ),
        compiler_params=pltpu.CompilerParams(
            dimension_semantics=("parallel",),
            # 32 MiB: raises v5e's 16 MiB default for large tiles; well under the
            # 64 MiB physical VMEM of v7x.
            vmem_limit_bytes=32 * 1024 * 1024),
    )(x, *weights, shifts)

    return out[:N, :out_features]


# --------------------------------- reference ------------------------------------


def fcnn_reference(x, raw, eps=1e-5):
    """Pure-JAX reference with eval-mode BatchNorm1d semantics."""
    h = x.astype(jnp.float32)
    for p in raw[:-1]:
        h = h @ p["w"].T + p["b"]
        h = (h - p["rm"]) / jnp.sqrt(p["rv"] + eps) * p["gamma"] + p["beta"]
        h = jnp.maximum(h, 0.0)
    logits = h @ raw[-1]["w"].T + raw[-1]["b"]
    return jax.nn.log_softmax(logits, axis=1)


if __name__ == "__main__":
    # sizes: input 16 -> hidden 32 -> hidden 32 -> output 10
    sizes = [16, 32, 32, 10]
    out_features = sizes[-1]

    key = jax.random.PRNGKey(0)
    key, pkey, xkey_small, xkey_big = jax.random.split(key, 4)

    raw = init_raw_params(sizes, pkey)
    weights_f32, shifts = fold_params(raw, out_features)

    # f32 path (strict check): single-tile batch and a ragged batch; the ragged
    # batch is also run with a small max_tile_rows to exercise a multi-step grid.
    for batch, xkey, tile_rows in ((8, xkey_small, 4096),
                                   (600, xkey_big, 4096),
                                   (600, xkey_big, 256)):
        x = jax.random.normal(xkey, (batch, sizes[0]), jnp.float32)
        out = fcnn_forward(x, weights_f32, shifts,
                           out_features=out_features, max_tile_rows=tile_rows)
        out = jax.block_until_ready(out)
        ref = fcnn_reference(x, raw)
        assert out.shape == (batch, out_features)
        assert jnp.allclose(out, ref, atol=1e-4, rtol=1e-4), \
            f"f32 mismatch vs. reference (batch={batch}, tile={tile_rows})"

    # bf16 weight/activation path (v6e/v7x MXU-native); log-softmax stays f32.
    weights_bf16, shifts_bf16 = fold_params(raw, out_features, dtype=jnp.bfloat16)
    x = jax.random.normal(xkey_big, (600, sizes[0]), jnp.float32)
    out_bf16 = fcnn_forward(x, weights_bf16, shifts_bf16, out_features=out_features)
    out_bf16 = jax.block_until_ready(out_bf16)
    ref = fcnn_reference(x, raw)
    assert out_bf16.shape == (600, out_features)
    assert jnp.allclose(out_bf16, ref, atol=1e-1, rtol=1e-1), \
        "bf16 mismatch vs. reference"

    print("KERNEL_OK")
</pallas_src>

<mosaic_0001>
module attributes {stable_mosaic.version = 11 : i64} {
  func.func @kernel(%arg0: i32, %arg1: memref<8x16xf32, #tpu.memory_space<vmem>>, %arg2: memref<16x128xf32, #tpu.memory_space<vmem>>, %arg3: memref<128x128xf32, #tpu.memory_space<vmem>>, %arg4: memref<128x128xf32, #tpu.memory_space<vmem>>, %arg5: memref<3x128xf32, #tpu.memory_space<vmem>>, %arg6: memref<8x10xf32, #tpu.memory_space<vmem>>) attributes {dimension_semantics = [#tpu.dimension_semantics<parallel>], iteration_bounds = array<i64: 1>, scalar_prefetch = 0 : i64, scratch_operands = 0 : i64, tpu.core_type = #tpu.core_type<tc>, window_params = [{transform_indices = @transform_0, window_bounds = array<i64: 8, 16>}, {pipeline_mode = #tpu.pipeline_mode<synchronous>, transform_indices = @transform_1, window_bounds = array<i64: 16, 128>}, {pipeline_mode = #tpu.pipeline_mode<synchronous>, transform_indices = @transform_2, window_bounds = array<i64: 128, 128>}, {pipeline_mode = #tpu.pipeline_mode<synchronous>, transform_indices = @transform_3, window_bounds = array<i64: 128, 128>}, {pipeline_mode = #tpu.pipeline_mode<synchronous>, transform_indices = @transform_4, window_bounds = array<i64: 3, 128>}, {transform_indices = @transform_5, window_bounds = array<i64: 8, 10>}]} {
    %c0 = arith.constant 0 : index
    %c0_0 = arith.constant 0 : index
    %0 = vector.load %arg1[%c0, %c0_0] : memref<8x16xf32, #tpu.memory_space<vmem>>, vector<8x16xf32>
    %c0_1 = arith.constant 0 : index
    %c0_2 = arith.constant 0 : index
    %1 = vector.load %arg5[%c0_1, %c0_2] : memref<3x128xf32, #tpu.memory_space<vmem>>, vector<1x128xf32>
    %c0_3 = arith.constant 0 : index
    %c0_4 = arith.constant 0 : index
    %2 = vector.load %arg2[%c0_3, %c0_4] : memref<16x128xf32, #tpu.memory_space<vmem>>, vector<16x128xf32>
    %cst = arith.constant dense<0.000000e+00> : vector<8x128xf32>
    %3 = tpu.matmul %0, %2, %cst {dimension_numbers = #tpu.dot_dimension_numbers<[1], [0], [0], [1], [0, 0, 1, 1], [], []>} : vector<8x16xf32>, vector<16x128xf32>, vector<8x128xf32> -> vector<8x128xf32>
    %4 = vector.broadcast %1 : vector<1x128xf32> to vector<8x128xf32>
    %5 = arith.addf %3, %4 : vector<8x128xf32>
    %cst_5 = arith.constant 0.000000e+00 : f32
    %6 = vector.broadcast %cst_5 : f32 to vector<8x128xf32>
    %7 = arith.maximumf %5, %6 : vector<8x128xf32>
    %c1 = arith.constant 1 : index
    %c0_6 = arith.constant 0 : index
    %8 = vector.load %arg5[%c1, %c0_6] : memref<3x128xf32, #tpu.memory_space<vmem>>, vector<1x128xf32>
    %c0_7 = arith.constant 0 : index
    %c0_8 = arith.constant 0 : index
    %9 = vector.load %arg3[%c0_7, %c0_8] : memref<128x128xf32, #tpu.memory_space<vmem>>, vector<128x128xf32>
    %cst_9 = arith.constant dense<0.000000e+00> : vector<8x128xf32>
    %10 = tpu.matmul %7, %9, %cst_9 {dimension_numbers = #tpu.dot_dimension_numbers<[1], [0], [0], [1], [0, 0, 1, 1], [], []>} : vector<8x128xf32>, vector<128x128xf32>, vector<8x128xf32> -> vector<8x128xf32>
    %11 = vector.broadcast %8 : vector<1x128xf32> to vector<8x128xf32>
    %12 = arith.addf %10, %11 : vector<8x128xf32>
    %cst_10 = arith.constant 0.000000e+00 : f32
    %13 = vector.broadcast %cst_10 : f32 to vector<8x128xf32>
    %14 = arith.maximumf %12, %13 : vector<8x128xf32>
    %c2 = arith.constant 2 : index
    %c0_11 = arith.constant 0 : index
    %15 = vector.load %arg5[%c2, %c0_11] : memref<3x128xf32, #tpu.memory_space<vmem>>, vector<1x128xf32>
    %c0_12 = arith.constant 0 : index
    %c0_13 = arith.constant 0 : index
    %16 = vector.load %arg4[%c0_12, %c0_13] : memref<128x128xf32, #tpu.memory_space<vmem>>, vector<128x128xf32>
    %cst_14 = arith.constant dense<0.000000e+00> : vector<8x128xf32>
    %17 = tpu.matmul %14, %16, %cst_14 {dimension_numbers = #tpu.dot_dimension_numbers<[1], [0], [0], [1], [0, 0, 1, 1], [], []>} : vector<8x128xf32>, vector<128x128xf32>, vector<8x128xf32> -> vector<8x128xf32>
    %18 = vector.broadcast %15 : vector<1x128xf32> to vector<8x128xf32>
    %19 = arith.addf %17, %18 : vector<8x128xf32>
    %cst_15 = arith.constant dense<0xFF800000> : vector<8xf32>
    %20 = vector.multi_reduction <maximumf>, %19, %cst_15 [1] : vector<8x128xf32> to vector<8xf32>
    %21 = vector.shape_cast %20 : vector<8xf32> to vector<8x1xf32>
    %22 = vector.broadcast %21 : vector<8x1xf32> to vector<8x128xf32>
    %23 = arith.subf %19, %22 : vector<8x128xf32>
    %24 = math.exp %23 : vector<8x128xf32>
    %cst_16 = arith.constant dense<0.000000e+00> : vector<8xf32>
    %25 = vector.multi_reduction <add>, %24, %cst_16 [1] : vector<8x128xf32> to vector<8xf32>
    %26 = vector.shape_cast %25 : vector<8xf32> to vector<8x1xf32>
    %27 = math.log %26 : vector<8x1xf32>
    %28 = arith.addf %27, %21 : vector<8x1xf32>
    %29 = vector.broadcast %28 : vector<8x1xf32> to vector<8x128xf32>
    %30 = arith.subf %19, %29 : vector<8x128xf32>
    %31 = vector.extract_strided_slice %30 {offsets = [0, 0], sizes = [8, 10], strides = [1, 1]} : vector<8x128xf32> to vector<8x10xf32>
    %c0_17 = arith.constant 0 : index
    %c0_18 = arith.constant 0 : index
    %32 = vector.load %arg6[%c0_17, %c0_18] : memref<8x10xf32, #tpu.memory_space<vmem>>, vector<8x10xf32>
    tpu.vector_store %arg6[%c0_17, %c0_18], %31 {strides = array<i32>} : memref<8x10xf32, #tpu.memory_space<vmem>>, vector<8x10xf32>,
    return
  }
  func.func @transform_0(%arg0: i32) -> (i32, i32) {
    %c0_i32 = arith.constant 0 : i32
    %c0_i32_0 = arith.constant 0 : i32
    return %arg0, %c0_i32 : i32, i32
  }
  func.func @transform_1(%arg0: i32) -> (i32, i32) {
    %c0_i32 = arith.constant 0 : i32
    %c0_i32_0 = arith.constant 0 : i32
    %c0_i32_1 = arith.constant 0 : i32
    return %c0_i32, %c0_i32_0 : i32, i32
  }
  func.func @transform_2(%arg0: i32) -> (i32, i32) {
    %c0_i32 = arith.constant 0 : i32
    %c0_i32_0 = arith.constant 0 : i32
    %c0_i32_1 = arith.constant 0 : i32
    return %c0_i32, %c0_i32_0 : i32, i32
  }
  func.func @transform_3(%arg0: i32) -> (i32, i32) {
    %c0_i32 = arith.constant 0 : i32
    %c0_i32_0 = arith.constant 0 : i32
    %c0_i32_1 = arith.constant 0 : i32
    return %c0_i32, %c0_i32_0 : i32, i32
  }
  func.func @transform_4(%arg0: i32) -> (i32, i32) {
    %c0_i32 = arith.constant 0 : i32
    %c0_i32_0 = arith.constant 0 : i32
    %c0_i32_1 = arith.constant 0 : i32
    return %c0_i32, %c0_i32_0 : i32, i32
  }
  func.func @transform_5(%arg0: i32) -> (i32, i32) {
    %c0_i32 = arith.constant 0 : i32
    %c0_i32_0 = arith.constant 0 : i32
    return %arg0, %c0_i32 : i32, i32
  }
}

</mosaic_0001>

<bundles_post_ra>
// kernel: fcnn_forward.1
= control target key start
LH: loop header
LB: loop body
LE: loop exit
PB: predicated region body
PF: predicated region fallthrough
CT: control target
= control target key end

     0   :  { %10 = vsyncpa [#allocation3], 0  ;;  %s809_s0 = inlined_call_operand.hbm [shape: f32[8,16], index: 0, kind: input, shape index: {}]   ;;  %s810_s1 = inlined_call_operand.hbm [shape: f32[16,128], index: 1, kind: input, shape index: {}]   ;;  %s811_s2 = inlined_call_operand.hbm [shape: f32[128,128], index: 2, kind: input, shape index: {}]   ;;  %s812_s3 = inlined_call_operand.hbm [shape: f32[128,128], index: 3, kind: input, shape index: {}]   ;;  %s813_s4 = inlined_call_operand.vmem [shape: f32[3,128], index: 4, kind: input, shape index: {}]   ;;  %s814_s5 = inlined_call_operand.hbm [shape: f32[8,10], index: 5, kind: output, shape index: {}]  }
   0x1   :  { %11 = vsyncpa [#allocation6], 0 }
   0x2   :  { %12 = vsyncpa [#allocation9], 0 }
   0x3   :  { %13 = vsyncpa [#allocation4], 0  ;;  %s671_s18 = smov [#allocation5]   ;;  %s553_s22 = scalar_lea.hbm %s810_s1, 256 }
   0x4   :  { %s29_s19 = sshll.u32 %s671_s18, 4  ;;  %p554_p0 = scmp.ne.s32.totalorder %s810_s1, %s553_s22  ;;  %s30_s19 = int_to_ptr.vmem [resolvable:$true] %s29_s19 }
   0x5   :  { %p557_p1 = scmp.lt.u32.totalorder %s553_s22, %s810_s1 }
   0x7   :  { %p559_p2 = pnand %p557_p1, %p554_p0 }
   0x9   :  { %562 = shalt.err (!%p559_p2)
}
   0xa   :  { %s563_s27 = scalar_lea.vmem %s30_s19, 256  ;;  %p568_p4 = scmp.lt.s32.totalorder %s30_s19, %s30_s19 }
   0xb   :  { %p564_p3 = scmp.ne.s32.totalorder %s30_s19, %s563_s27  ;;  %p569_p5 = scmp.lt.s32.totalorder %s563_s27, %s563_s27 }
   0xd   :  { %p570_p6 = por %p569_p5, %p568_p4 }
   0xf   :  { %p571_p7 = pnand %p570_p6, %p564_p3 }
  0x11   :  { %574 = shalt.err (!%p571_p7)
}
  0x12   :  { %s672_s28 = smov 128   ;;  %s673_s29 = smov 8  }
  0x13   :  { %35 = dma.hbm_to_vmem [thread:$0]  %s810_s1, 256, %s30_s19, [#allocation6], %s672_s28, %s672_s28, %s673_s29  }
  0x14   :  { %s674_s7 = smov [#allocation2]   ;;  %s675_s9 = smov [#allocation7]  }
  0x15   :  { %s20_s8 = sshll.u32 %s674_s7, 4  ;;  %s41_s10 = sshll.u32 %s675_s9, 4  ;;  %s21_s8 = int_to_ptr.vmem [resolvable:$true] %s20_s8  ;;  %s42_s10 = int_to_ptr.vmem [resolvable:$true] %s41_s10 }
  0x16   :  { %s575_s13 = scalar_lea.hbm %s809_s0, 128 }
  0x17   :  { %p576_p8 = scmp.ne.s32.totalorder %s809_s0, %s575_s13  ;;  %p579_p9 = scmp.lt.u32.totalorder %s575_s13, %s809_s0 }
  0x19   :  { %p581_p10 = pnand %p579_p9, %p576_p8 }
  0x1b   :  { %584 = shalt.err (!%p581_p10)
}
  0x1c   :  { %s585_s1 = scalar_lea.vmem %s21_s8, 128  ;;  %p590_p12 = scmp.lt.s32.totalorder %s21_s8, %s21_s8 }
  0x1d   :  { %p586_p11 = scmp.ne.s32.totalorder %s21_s8, %s585_s1  ;;  %p591_p13 = scmp.lt.s32.totalorder %s585_s1, %s585_s1 }
  0x1f   :  { %p592_p0 = por %p591_p13, %p590_p12 }
  0x21   :  { %p593_p1 = pnand %p592_p0, %p586_p11 }
  0x23   :  { %596 = shalt.err (!%p593_p1)
}
  0x24   :  { %23 = dma.hbm_to_vmem [thread:$0]  %s809_s0, 128, %s21_s8, [#allocation3]  }
  0x25   :  { %s597_s22 = scalar_lea.hbm %s811_s2, 2048 }
  0x26   :  { %p598_p2 = scmp.ne.s32.totalorder %s811_s2, %s597_s22  ;;  %p601_p3 = scmp.lt.u32.totalorder %s597_s22, %s811_s2 }
  0x28   :  { %p603_p4 = pnand %p601_p3, %p598_p2 }
  0x2a   :  { %606 = shalt.err (!%p603_p4)
}
  0x2b   :  { %s607_s27 = scalar_lea.vmem %s42_s10, 2048  ;;  %p612_p6 = scmp.lt.s32.totalorder %s42_s10, %s42_s10 }
  0x2c   :  { %p608_p5 = scmp.ne.s32.totalorder %s42_s10, %s607_s27  ;;  %p613_p7 = scmp.lt.s32.totalorder %s607_s27, %s607_s27 }
  0x2e   :  { %p614_p8 = por %p613_p7, %p612_p6 }
  0x30   :  { %p615_p9 = pnand %p614_p8, %p608_p5 }
  0x32   :  { %618 = shalt.err (!%p615_p9)
}
  0x33   :  { %47 = dma.hbm_to_vmem [thread:$0]  %s811_s2, 2048, %s42_s10, [#allocation6], %s672_s28, %s672_s28, %s673_s29  }
  0x34   :  { %s676_s6 = smov [#allocation8]   ;;  %s619_s11 = scalar_lea.hbm %s812_s3, 2048 }
  0x35   :  { %s53_s7 = sshll.u32 %s676_s6, 4  ;;  %p620_p10 = scmp.ne.s32.totalorder %s812_s3, %s619_s11  ;;  %s54_s7 = int_to_ptr.vmem [resolvable:$true] %s53_s7 }
  0x36   :  { %p623_p11 = scmp.lt.u32.totalorder %s619_s11, %s812_s3 }
  0x38   :  { %p625_p12 = pnand %p623_p11, %p620_p10 }
  0x3a   :  { %628 = shalt.err (!%p625_p12)
}
  0x3b   :  { %s629_s16 = scalar_lea.vmem %s54_s7, 2048  ;;  %p634_p0 = scmp.lt.s32.totalorder %s54_s7, %s54_s7 }
  0x3c   :  { %p630_p13 = scmp.ne.s32.totalorder %s54_s7, %s629_s16  ;;  %p635_p1 = scmp.lt.s32.totalorder %s629_s16, %s629_s16 }
  0x3e   :  { %p636_p2 = por %p635_p1, %p634_p0 }
  0x40   :  { %p637_p3 = pnand %p636_p2, %p630_p13 }
  0x42   :  { %640 = shalt.err (!%p637_p3)
}
  0x43   :  { %59 = dma.hbm_to_vmem [thread:$0]  %s812_s3, 2048, %s54_s7, [#allocation9], %s672_s28, %s672_s28, %s673_s29  }
  0x44   :  { %663 = dma.done.wait [#allocation3], 128  }
  0x45   :  { %664 = vsyncadd [#allocation3], 4294967168 }
  0x46   :  { %665 = dma.done.wait [#allocation6], 2304  }
  0x47   :  { %666 = vsyncadd [#allocation6], 4294964992 }
  0x48   :  { %667 = dma.done.wait [#allocation9], 2048  }
  0x49   :  { %668 = vsyncadd [#allocation9], 4294965248  ;;  %v677_v0 = vmov 0.0|0.0   ;;  %vm678_vm0 = vmmov 0   ;;  %v679_v1 = vmov 0.0   ;;  %v76_v2 = vld [vmem:[#allocation5] sm:$0xff] }
  0x4a   :  { %488 = vmatprep.subr.bf16.mxu0 %v677_v0  ;;  %415 = vmatprep.mubr.msk.f32.mxu0 %vm678_vm0, %v679_v1  ;;  %v77_v3 = vld [vmem:[#allocation5 + $0x8] sm:$0xff]  ;;  %v158_v5 = vld [vmem:[#allocation7] sm:$0xff]  ;;  %v159_v6 = vld [vmem:[#allocation7 + $0x8] sm:$0xff]  ;;  %vm82_vm1 = vcmask 130048   ;;  %s680_s19 = smov [#allocation10]   ;;  %vm351_vm2 = vcmask 80896  }
  0x4b   :  { %491 = vmatprep.subr.bf16.mxu1 %v677_v0  ;;  %450 = vmatprep.mubr.msk.f32.mxu1 %vm678_vm0, %v679_v1  ;;  %v489_v4 = vpack.c.bf16 %v77_v3, %v76_v2  ;;  %v160_v7 = vld [vmem:[#allocation7 + $0x10] sm:$0xff]  ;;  %v492_v8 = vpack.c.bf16 %v159_v6, %v158_v5  ;;  %v161_v9 = vld [vmem:[#allocation7 + $0x18] sm:$0xff]  ;;  %v74_v10 = vld [vmem:[#allocation2] sm:$0xff]  ;;  %s359_s20 = sshll.u32 %s680_s19, 4  ;;  %s360_s20 = int_to_ptr.vmem [resolvable:$true] %s359_s20 }
  0x4c   :  { %v495_v11 = vpack.c.bf16 %v161_v9, %v160_v7  ;;  %v162_v12 = vld [vmem:[#allocation7 + $0x20] sm:$0xff]  ;;  %v163_v13 = vld [vmem:[#allocation7 + $0x28] sm:$0xff]  ;;  %v164_v15 = vld [vmem:[#allocation7 + $0x30] sm:$0xff]  ;;  %p646_p5 = scmp.lt.s32.totalorder %s360_s20, %s360_s20 }
  0x4d   :  { %490 = vmatpush3.bf16.msra.mxu0 %v489_v4  ;;  %493 = vmatpush3.bf16.msra.mxu1 %v492_v8  ;;  %v498_v14 = vpack.c.bf16 %v163_v13, %v162_v12  ;;  %v165_v16 = vld [vmem:[#allocation7 + $0x38] sm:$0xff]  ;;  %v166_v18 = vld [vmem:[#allocation7 + $0x40] sm:$0xff]  ;;  %v167_v19 = vld [vmem:[#allocation7 + $0x48] sm:$0xff] }
  0x4e   :  { %515 = vmatprep.subr.bf16.mxu0 %v677_v0  ;;  %494 = vmatprep.subr.bf16.mxu1 %v677_v0  ;;  %v501_v17 = vpack.c.bf16 %v165_v16, %v164_v15  ;;  %v504_v20 = vpack.c.bf16 %v167_v19, %v166_v18  ;;  %v168_v21 = vld [vmem:[#allocation7 + $0x50] sm:$0xff]  ;;  %v169_v22 = vld [vmem:[#allocation7 + $0x58] sm:$0xff]  ;;  %v170_v24 = vld [vmem:[#allocation7 + $0x60] sm:$0xff] }
  0x4f   :  { %v507_v23 = vpack.c.bf16 %v169_v22, %v168_v21  ;;  %v171_v25 = vld [vmem:[#allocation7 + $0x68] sm:$0xff]  ;;  %v172_v27 = vld [vmem:[#allocation7 + $0x70] sm:$0xff]  ;;  %v173_v28 = vld [vmem:[#allocation7 + $0x78] sm:$0xff] }
  0x50   :  { %416 = vmatmul.mubr.msk.f32.vlgmr.msra.gmra.mrb[0].mxu0 %vm82_vm1, %v74_v10  ;;  %v510_v26 = vpack.c.bf16 %v171_v25, %v170_v24  ;;  %v513_v29 = vpack.c.bf16 %v173_v28, %v172_v27  ;;  %v250_v30 = vld [vmem:[#allocation8] sm:$0xff]  ;;  %v251_v31 = vld [vmem:[#allocation8 + $0x8] sm:$0xff]  ;;  %v252_v32 = vld [vmem:[#allocation8 + $0x10] sm:$0xff] }
  0x51   :  { %485 = vmatprep.mubr.msk.f32.mxu0 %vm678_vm0, %v679_v1  ;;  %496 = vmatpush3.bf16.msra.mxu1 %v495_v11  ;;  %v516_v33 = vpack.c.bf16 %v251_v31, %v250_v30  ;;  %v253_v34 = vld [vmem:[#allocation8 + $0x18] sm:$0xff]  ;;  %v254_v36 = vld [vmem:[#allocation8 + $0x20] sm:$0xff]  ;;  %v255_v37 = vld [vmem:[#allocation8 + $0x28] sm:$0xff] }
  0x52   :  { %497 = vmatprep.subr.bf16.mxu1 %v677_v0  ;;  %v519_v35 = vpack.c.bf16 %v253_v34, %v252_v32  ;;  %v522_v38 = vpack.c.bf16 %v255_v37, %v254_v36  ;;  %v256_v39 = vld [vmem:[#allocation8 + $0x30] sm:$0xff]  ;;  %v257_v40 = vld [vmem:[#allocation8 + $0x38] sm:$0xff]  ;;  %v258_v42 = vld [vmem:[#allocation8 + $0x40] sm:$0xff] }
  0x53   :  { %517 = vmatpush3.bf16.msra.mxu0 %v516_v33  ;;  %v525_v41 = vpack.c.bf16 %v257_v40, %v256_v39  ;;  %v259_v43 = vld [vmem:[#allocation8 + $0x48] sm:$0xff]  ;;  %v260_v45 = vld [vmem:[#allocation8 + $0x50] sm:$0xff]  ;;  %v261_v46 = vld [vmem:[#allocation8 + $0x58] sm:$0xff] }
  0x54   :  { %518 = vmatprep.subr.bf16.mxu0 %v677_v0  ;;  %v528_v44 = vpack.c.bf16 %v259_v43, %v258_v42  ;;  %v531_v47 = vpack.c.bf16 %v261_v46, %v260_v45  ;;  %v262_v48 = vld [vmem:[#allocation8 + $0x60] sm:$0xff]  ;;  %v263_v49 = vld [vmem:[#allocation8 + $0x68] sm:$0xff]  ;;  %v264_v56 = vld [vmem:[#allocation8 + $0x70] sm:$0xff] }
  0x55   :  { %499 = vmatpush3.bf16.msra.mxu1 %v498_v14  ;;  %v534_v50 = vpack.c.bf16 %v263_v49, %v262_v48  ;;  %v370_v51 = vld [vmem:[%s813_s4] ss:$0 sm:$0xff]  ;;  %v265_v57 = vld [vmem:[#allocation8 + $0x78] sm:$0xff]  ;;  %v372_v59 = vld [vmem:[%s813_s4 + $0x1] ss:$0 sm:$0xff] }
  0x56   :  { %500 = vmatprep.subr.bf16.mxu1 %v677_v0  ;;  %v537_v58 = vpack.c.bf16 %v265_v57, %v264_v56 }
  0x57   :  { %520 = vmatpush3.bf16.msra.mxu0 %v519_v35 }
  0x58   :  { %521 = vmatprep.subr.bf16.mxu0 %v677_v0 }
  0x59   :  { %502 = vmatpush3.bf16.msra.mxu1 %v501_v17 }
  0x5a   :  { %503 = vmatprep.subr.bf16.mxu1 %v677_v0 }
  0x5b   :  { %523 = vmatpush3.bf16.msra.mxu0 %v522_v38 }
  0x5c   :  { %524 = vmatprep.subr.bf16.mxu0 %v677_v0 }
  0x5d   :  { %505 = vmatpush3.bf16.msra.mxu1 %v504_v20 }
  0x5e   :  { %506 = vmatprep.subr.bf16.mxu1 %v677_v0 }
  0x5f   :  { %526 = vmatpush3.bf16.msra.mxu0 %v525_v41 }
  0x60   :  { %527 = vmatprep.subr.bf16.mxu0 %v677_v0 }
  0x61   :  { %508 = vmatpush3.bf16.msra.mxu1 %v507_v23 }
  0x62   :  { %509 = vmatprep.subr.bf16.mxu1 %v677_v0 }
  0x63   :  { %529 = vmatpush3.bf16.msra.mxu0 %v528_v44 }
  0x64   :  { %530 = vmatprep.subr.bf16.mxu0 %v677_v0 }
  0x65   :  { %511 = vmatpush3.bf16.msra.mxu1 %v510_v26 }
  0x66   :  { %512 = vmatprep.subr.bf16.mxu1 %v677_v0 }
  0x67   :  { %532 = vmatpush3.bf16.msra.mxu0 %v531_v47 }
  0x68   :  { %533 = vmatprep.subr.bf16.mxu0 %v677_v0 }
  0x69   :  { %514 = vmatpush3.bf16.msra.mxu1 %v513_v29 }
  0x6b   :  { %535 = vmatpush3.bf16.msra.mxu0 %v534_v50 }
  0x6c   :  { %536 = vmatprep.subr.bf16.mxu0 %v677_v0  ;;  %v373_v0 = vld [vmem:[%s813_s4 + $0x2] ss:$0 sm:$0xff]  ;;  %s641_s4 = scalar_lea.vmem %s360_s20, 128 }
  0x6d   :  { %p642_p4 = scmp.ne.s32.totalorder %s360_s20, %s641_s4  ;;  %p647_p6 = scmp.lt.s32.totalorder %s641_s4, %s641_s4 }
  0x6f   :  { %538 = vmatpush3.bf16.msra.mxu0 %v537_v58  ;;  %p648_p7 = por %p647_p6, %p646_p5 }
  0x71   :  { %p649_p8 = pnand %p648_p7, %p642_p4 }
 0x123   :  { %v152_v52 = vpop.f32.mrb[0].mxu0 }
 0x124   :  { %v153_v53 = vadd.f32 %v370_v51, %v152_v52  ;;  %v417_v54 = vpop.f32.mrb[1].mxu0 }
 0x126   :  { %v156_v55 = vmax.f32 %v153_v53, 0.0 }
 0x128   :  { %451 = vmatmul.mubr.f32.vlgmr.msra.gmra.mrb[0].mxu1 %v156_v55 }
 0x1fb   :  { %v244_v60 = vpop.f32.mrb[0].mxu1 }
 0x1fc   :  { %v245_v61 = vadd.f32 %v372_v59, %v244_v60  ;;  %v452_v62 = vpop.f32.mrb[1].mxu1 }
 0x1fe   :  { %v248_v63 = vmax.f32 %v245_v61, 0.0 }
 0x200   :  { %486 = vmatmul.mubr.f32.vlgmr.msra.gmra.mrb[2].mxu0 %v248_v63 }
 0x2d3   :  { %v336_v1 = vpop.f32.mrb[2].mxu0 }
 0x2d4   :  { %v337_v2 = vadd.f32 %v373_v0, %v336_v1  ;;  %v487_v3 = vpop.f32.mrb[3].mxu0 }
 0x2d6   :  { %340 = vmax.xlane.f32.xlu0 %v337_v2 }
 0x363   :  { %v341_v4 = vpop.xlane.xlu0 %340 }
 0x364   :  { %v342_v5 = vsub.f32 %v337_v2, %v341_v4 }
 0x366   :  { %v343_v6 = vmul.f32 1.442695, %v342_v5 }
 0x368   :  { %549 = vpow2.f32 %v343_v6 }
 0x372   :  { %v550_v7 = vpop.eup %549 }
 0x373   :  { %345 = vadd.xlane.f32.xlu0 %v550_v7 }
 0x400   :  { %v346_v8 = vpop.xlane.xlu0 %345 }
 0x401   :  { %551 = vlog2.f32 %v346_v8 }
 0x40b   :  { %v552_v9 = vpop.eup %551 }
 0x40c   :  { %v348_v10 = vmul.f32 0.6931472, %v552_v9 }
 0x40e   :  { %v349_v11 = vadd.f32 %v348_v10, %v341_v4 }
 0x410   :  { %v350_v12 = vsub.f32 %v337_v2, %v349_v11 }
 0x412   :  { %352 = vst.msk [vmem:[#allocation10] sm:$0xff] %vm351_vm2, %v350_v12 }
 0x413   :  { %652 = shalt.err (!%p649_p8)
}
 0x414   :  { %s653_s23 = scalar_lea.hbm %s814_s5, 128 }
 0x415   :  { %p654_p9 = scmp.ne.s32.totalorder %s814_s5, %s653_s23  ;;  %p657_p10 = scmp.lt.u32.totalorder %s653_s23, %s814_s5 }
 0x417   :  { %p659_p11 = pnand %p657_p10, %p654_p9 }
 0x419   :  { %662 = shalt.err (!%p659_p11)
}
 0x41a   :  { %362 = dma.vmem_to_hbm [thread:$0]  %s360_s20, 128, %s814_s5, [#allocation4]  }
 0x41b   :  { %669 = dma.done.wait [#allocation4], 128  }
 0x41c   :  { %670 = vsyncadd [#allocation4], 4294967168 }
 0x41d   :  { %366 = vsyncpa [#allocation3], 1 }
 0x41e   :  { %367 = vsyncpa [#allocation6], 1 }
 0x41f   :  { %368 = vsyncpa [#allocation9], 1 }
 0x420   :  { %369 = vsyncpa [#allocation4], 1 }

</bundles_post_ra>
